<compile_context>
chip_gen: v7x
topology: tpu7x:2x2x1
jax: 0.10.0
libtpu: 0.0.40
codegen_flags: <defaults>
</compile_context>

<pallas_src>
import functools

import jax
import jax.numpy as jnp
from jax.experimental import pallas as pl
from jax.experimental.pallas import tpu as pltpu


def conv_block_kernel(x_ref, w_ref, flags_ref, o_ref, *, N, C, H, W, act,
                      mxu_dtype):
    """x_ref: (C, N*H*W) f32 -- one row per channel, all N images packed along
    lanes (lane = n*H*W + h*W + w); w_ref: (C, 9*C) f32 with column
    t*C + i = w[o, i, kh, kw], t = kh*3 + kw; flags_ref: (C, N*H*W) int32 edge
    flags (bit0 h==0, bit1 h==H-1, bit2 w==0, bit3 w==W-1);
    o_ref: (C, N*H*W)."""
    NHW = N * H * W
    HW = H * W
    x = x_ref[...]

    # Precomputed edge flags -> four boolean masks (4 cheap bit tests).
    flags = flags_ref[...]
    row_lo = (flags & 1) != 0
    row_hi = (flags & 2) != 0
    col_lo = (flags & 4) != 0
    col_hi = (flags & 8) != 0

    def shifted3(a, step, m_lo, m_hi):
        # Returns (value at idx-step, a, value at idx+step) along the packed
        # lane axis with PyTorch 'reflect' handling at the plane edges
        # (idx -1 -> 1, idx max+1 -> max-1).  Lanes whose roll wraps across an
        # image (or array) boundary are exactly the masked edge lanes, so the
        # wrap never leaks.  pltpu.roll runs on the otherwise-idle XLU slot.
        fwd = pltpu.roll(a, (-step) % NHW, axis=1)   # value at idx + step
        bwd = pltpu.roll(a, step % NHW, axis=1)      # value at idx - step
        minus = jnp.where(m_lo, fwd, bwd)            # reflect(idx - step)
        plus = jnp.where(m_hi, bwd, fwd)             # reflect(idx + step)
        return minus, a, plus

    # 9 shifted taps in (kh, kw) row-major order (t = kh*3 + kw); stacked so
    # sublane row t*C + i holds input channel i of tap t, matching the
    # wrapper's packed weight layout.
    taps = []
    for r in shifted3(x, W, row_lo, row_hi):          # kh = 0, 1, 2
        taps.extend(shifted3(r, 1, col_lo, col_hi))   # kw = 0, 1, 2
    stacked = jnp.concatenate(taps, axis=0)           # (9*C, N*H*W)

    # One MXU push: (C, 9*C) @ (9*C, N*H*W) with f32 accumulate.
    # Conv bias omitted: exactly cancelled by the affine=False InstanceNorm.
    acc = jnp.dot(w_ref[...].astype(mxu_dtype), stacked.astype(mxu_dtype),
                  preferred_element_type=jnp.float32)  # (C, N*H*W)

    # InstanceNorm2d (affine=False, eps=1e-5) + ReLU, stats per (n, c) plane.
    # Single reduction pass per plane: sum and sum-of-squares taken directly
    # from acc (var = E[x^2] - E[x]^2).  Per-image segments are static,
    # lane-aligned slices (HW is a multiple of 128 here); N is small, so the
    # Python loop is a tiny unroll.
    inv_hw = 1.0 / HW
    for n in range(N):
        seg = acc[:, n * HW:(n + 1) * HW]                       # (C, H*W)
        mu = jnp.sum(seg, axis=1, keepdims=True) * inv_hw
        ex2 = jnp.sum(seg * seg, axis=1, keepdims=True) * inv_hw
        var = ex2 - mu * mu
        y = (seg - mu) * jax.lax.rsqrt(var + 1e-5)
        if act:
            y = jnp.maximum(y, 0.0)
        o_ref[:, n * HW:(n + 1) * HW] = y.astype(o_ref.dtype)


def conv_block(x, w, b=None, *, act=True, mxu_dtype=jnp.float32):
    """ConvBlock forward.  x: (N, C, H, W); w: (C, C, 3, 3) OIHW; b: (C,).
    `b` is accepted for API parity but never read: a constant per-channel
    bias is exactly cancelled by the affine=False InstanceNorm.
    `mxu_dtype=jnp.bfloat16` uses bf16 MXU inputs (single-pass on the
    bf16-native v6e/v7x MXU) with f32 accumulation."""
    # TODO(synk): down=False (ConvTranspose2d) and stride != 1 / non-3x3
    # kernel_size variants of ConvBlock are not implemented in this kernel.
    # TODO(synk): for the residual-block use case, fuse the two back-to-back
    # ConvBlocks into one pallas_call and keep the lane-dense (C, N*H*W)
    # layout between them -- at this size invocation/relayout overhead
    # dominates everything inside the kernel.
    # TODO(synk): when scaling the problem up, add a leading "parallel" grid
    # axis (over N or channel blocks) so both v7x TensorCores get work.
    del b
    N, C, H, W = x.shape
    assert w.shape == (C, C, 3, 3)
    assert H >= 2 and W >= 2
    NHW, HW = N * H * W, H * W

    # Lane-dense relayout (pure layout plumbing): one row per channel, all N
    # images packed along lanes.
    x2 = jnp.transpose(x, (1, 0, 2, 3)).reshape(C, NHW).astype(jnp.float32)

    # Per-tap channel-mixing weights packed for a single K = 9*C matmul:
    #   wk[o, t*C + i] = w[o, i, kh, kw],  t = kh*3 + kw.
    wk = (w.astype(jnp.float32).reshape(C, C, 9)
          .transpose(0, 2, 1).reshape(C, 9 * C))

    # Edge flags (compile-time function of N, H, W) hoisted out of the kernel.
    p = jnp.arange(NHW, dtype=jnp.int32) % HW
    row, col = p // W, p % W
    flags1 = ((row == 0).astype(jnp.int32)
              | ((row == H - 1).astype(jnp.int32) << 1)
              | ((col == 0).astype(jnp.int32) << 2)
              | ((col == W - 1).astype(jnp.int32) << 3))
    flags = jnp.tile(flags1[None, :], (C, 1))

    vmem = pl.BlockSpec(memory_space=pltpu.MemorySpace.VMEM)
    out = pl.pallas_call(
        functools.partial(conv_block_kernel, N=N, C=C, H=H, W=W, act=act,
                          mxu_dtype=mxu_dtype),
        out_shape=jax.ShapeDtypeStruct((C, NHW), x.dtype),
        in_specs=[vmem, vmem, vmem],
        out_specs=vmem,
    )(x2, wk, flags)
    # (C, N*H*W) -> (N, C, H, W).
    return out.reshape(C, N, H, W).transpose(1, 0, 2, 3)


def conv_block_ref(x, w, b, *, act=True):
    """Pure-JAX reference matching PyTorch ConvBlock semantics (bias kept)."""
    xp = jnp.pad(x, ((0, 0), (0, 0), (1, 1), (1, 1)), mode="reflect")
    y = jax.lax.conv_general_dilated(
        xp, w, window_strides=(1, 1), padding="VALID",
        dimension_numbers=("NCHW", "OIHW", "NCHW"),
        precision=jax.lax.Precision.HIGHEST)
    y = y + b[None, :, None, None]
    mu = y.mean(axis=(2, 3), keepdims=True)
    var = ((y - mu) ** 2).mean(axis=(2, 3), keepdims=True)
    y = (y - mu) * jax.lax.rsqrt(var + 1e-5)
    return jnp.maximum(y, 0.0) if act else y


if __name__ == "__main__":
    N, C, H, W = 2, 4, 16, 16
    key = jax.random.PRNGKey(0)
    kx, kw, kb = jax.random.split(key, 3)

    x = jax.random.normal(kx, (N, C, H, W), dtype=jnp.float32)
    # Deterministic synthetic parameters (nn.Conv2d(C, C, 3, padding=1)).
    w = jax.random.normal(kw, (C, C, 3, 3), dtype=jnp.float32) * 0.1
    b = jax.random.normal(kb, (C,), dtype=jnp.float32) * 0.1

    ref = jax.block_until_ready(conv_block_ref(x, w, b))

    # f32 MXU path (matches PyTorch numerics; also verifies that dropping the
    # bias is exact -- the reference includes it).
    out = jax.block_until_ready(conv_block(x, w, b))
    assert out.shape == (N, C, H, W)
    assert jnp.allclose(out, ref, atol=2e-4, rtol=2e-4), "f32 mismatch vs ref"

    # bf16 MXU inputs with f32 accumulate (v6e/v7x single-pass MXU), checked
    # at a tolerance appropriate for bf16 input rounding.
    out_bf16 = jax.block_until_ready(conv_block(x, w, b,
                                                mxu_dtype=jnp.bfloat16))
    assert jnp.allclose(out_bf16, ref, atol=5e-2, rtol=5e-2), \
        "bf16-MXU mismatch vs ref"

    print("KERNEL_OK")
</pallas_src>

<mosaic_0001>
module attributes {stable_mosaic.version = 11 : i64} {
  func.func @conv_block_kernel(%arg0: memref<4x512xf32, #tpu.memory_space<vmem>>, %arg1: memref<4x36xf32, #tpu.memory_space<vmem>>, %arg2: memref<4x512xi32, #tpu.memory_space<vmem>>, %arg3: memref<4x512xf32, #tpu.memory_space<vmem>>) attributes {dimension_semantics = [], scalar_prefetch = 0 : i64, scratch_operands = 0 : i64, tpu.core_type = #tpu.core_type<tc>} {
    %c0 = arith.constant 0 : index
    %c0_0 = arith.constant 0 : index
    %0 = vector.load %arg0[%c0, %c0_0] : memref<4x512xf32, #tpu.memory_space<vmem>>, vector<4x512xf32>
    %c0_1 = arith.constant 0 : index
    %c0_2 = arith.constant 0 : index
    %1 = vector.load %arg2[%c0_1, %c0_2] : memref<4x512xi32, #tpu.memory_space<vmem>>, vector<4x512xi32>
    %c1_i32 = arith.constant 1 : i32
    %2 = vector.broadcast %c1_i32 : i32 to vector<4x512xi32>
    %3 = arith.andi %1, %2 : vector<4x512xi32>
    %c0_i32 = arith.constant 0 : i32
    %4 = vector.broadcast %c0_i32 : i32 to vector<4x512xi32>
    %5 = arith.cmpi ne, %3, %4 : vector<4x512xi32>
    %c2_i32 = arith.constant 2 : i32
    %6 = vector.broadcast %c2_i32 : i32 to vector<4x512xi32>
    %7 = arith.andi %1, %6 : vector<4x512xi32>
    %c0_i32_3 = arith.constant 0 : i32
    %8 = vector.broadcast %c0_i32_3 : i32 to vector<4x512xi32>
    %9 = arith.cmpi ne, %7, %8 : vector<4x512xi32>
    %c4_i32 = arith.constant 4 : i32
    %10 = vector.broadcast %c4_i32 : i32 to vector<4x512xi32>
    %11 = arith.andi %1, %10 : vector<4x512xi32>
    %c0_i32_4 = arith.constant 0 : i32
    %12 = vector.broadcast %c0_i32_4 : i32 to vector<4x512xi32>
    %13 = arith.cmpi ne, %11, %12 : vector<4x512xi32>
    %c8_i32 = arith.constant 8 : i32
    %14 = vector.broadcast %c8_i32 : i32 to vector<4x512xi32>
    %15 = arith.andi %1, %14 : vector<4x512xi32>
    %c0_i32_5 = arith.constant 0 : i32
    %16 = vector.broadcast %c0_i32_5 : i32 to vector<4x512xi32>
    %17 = arith.cmpi ne, %15, %16 : vector<4x512xi32>
    %c496_i32 = arith.constant 496 : i32
    %18 = tpu.dynamic_rotate %0 by %c496_i32 dim 1 : vector<4x512xf32>, i32 -> vector<4x512xf32>
    %c16_i32 = arith.constant 16 : i32
    %19 = tpu.dynamic_rotate %0 by %c16_i32 dim 1 : vector<4x512xf32>, i32 -> vector<4x512xf32>
    %20 = arith.select %5, %18, %19 : vector<4x512xi1>, vector<4x512xf32>
    %21 = arith.select %9, %19, %18 : vector<4x512xi1>, vector<4x512xf32>
    %c511_i32 = arith.constant 511 : i32
    %22 = tpu.dynamic_rotate %20 by %c511_i32 dim 1 : vector<4x512xf32>, i32 -> vector<4x512xf32>
    %c1_i32_6 = arith.constant 1 : i32
    %23 = tpu.dynamic_rotate %20 by %c1_i32_6 dim 1 : vector<4x512xf32>, i32 -> vector<4x512xf32>
    %24 = arith.select %13, %22, %23 : vector<4x512xi1>, vector<4x512xf32>
    %25 = arith.select %17, %23, %22 : vector<4x512xi1>, vector<4x512xf32>
    %c511_i32_7 = arith.constant 511 : i32
    %26 = tpu.dynamic_rotate %0 by %c511_i32_7 dim 1 : vector<4x512xf32>, i32 -> vector<4x512xf32>
    %c1_i32_8 = arith.constant 1 : i32
    %27 = tpu.dynamic_rotate %0 by %c1_i32_8 dim 1 : vector<4x512xf32>, i32 -> vector<4x512xf32>
    %28 = arith.select %13, %26, %27 : vector<4x512xi1>, vector<4x512xf32>
    %29 = arith.select %17, %27, %26 : vector<4x512xi1>, vector<4x512xf32>
    %c511_i32_9 = arith.constant 511 : i32
    %30 = tpu.dynamic_rotate %21 by %c511_i32_9 dim 1 : vector<4x512xf32>, i32 -> vector<4x512xf32>
    %c1_i32_10 = arith.constant 1 : i32
    %31 = tpu.dynamic_rotate %21 by %c1_i32_10 dim 1 : vector<4x512xf32>, i32 -> vector<4x512xf32>
    %32 = arith.select %13, %30, %31 : vector<4x512xi1>, vector<4x512xf32>
    %33 = arith.select %17, %31, %30 : vector<4x512xi1>, vector<4x512xf32>
    %34 = tpu.concatenate %24, %20, %25, %28, %0, %29, %32, %21, %33 in 0 : vector<4x512xf32>, vector<4x512xf32>, vector<4x512xf32>, vector<4x512xf32>, vector<4x512xf32>, vector<4x512xf32>, vector<4x512xf32>, vector<4x512xf32>, vector<4x512xf32> -> vector<36x512xf32>
    %c0_11 = arith.constant 0 : index
    %c0_12 = arith.constant 0 : index
    %35 = vector.load %arg1[%c0_11, %c0_12] : memref<4x36xf32, #tpu.memory_space<vmem>>, vector<4x36xf32>
    %cst = arith.constant dense<0.000000e+00> : vector<4x512xf32>
    %36 = tpu.matmul %35, %34, %cst {dimension_numbers = #tpu.dot_dimension_numbers<[1], [0], [0], [1], [0, 0, 1, 1], [], []>} : vector<4x36xf32>, vector<36x512xf32>, vector<4x512xf32> -> vector<4x512xf32>
    %37 = vector.extract_strided_slice %36 {offsets = [0, 0], sizes = [4, 256], strides = [1, 1]} : vector<4x512xf32> to vector<4x256xf32>
    %cst_13 = arith.constant dense<0.000000e+00> : vector<4xf32>
    %38 = vector.multi_reduction <add>, %37, %cst_13 [1] : vector<4x256xf32> to vector<4xf32>
    %39 = vector.shape_cast %38 : vector<4xf32> to vector<4x1xf32>
    %cst_14 = arith.constant 3.906250e-03 : f32
    %40 = vector.broadcast %cst_14 : f32 to vector<4x1xf32>
    %41 = arith.mulf %39, %40 : vector<4x1xf32>
    %42 = arith.mulf %37, %37 : vector<4x256xf32>
    %cst_15 = arith.constant dense<0.000000e+00> : vector<4xf32>
    %43 = vector.multi_reduction <add>, %42, %cst_15 [1] : vector<4x256xf32> to vector<4xf32>
    %44 = vector.shape_cast %43 : vector<4xf32> to vector<4x1xf32>
    %cst_16 = arith.constant 3.906250e-03 : f32
    %45 = vector.broadcast %cst_16 : f32 to vector<4x1xf32>
    %46 = arith.mulf %44, %45 : vector<4x1xf32>
    %47 = arith.mulf %41, %41 : vector<4x1xf32>
    %48 = arith.subf %46, %47 : vector<4x1xf32>
    %49 = vector.broadcast %41 : vector<4x1xf32> to vector<4x256xf32>
    %50 = arith.subf %37, %49 : vector<4x256xf32>
    %cst_17 = arith.constant 9.99999974E-6 : f32
    %51 = vector.broadcast %cst_17 : f32 to vector<4x1xf32>
    %52 = arith.addf %48, %51 : vector<4x1xf32>
    %53 = math.rsqrt %52 : vector<4x1xf32>
    %54 = vector.broadcast %53 : vector<4x1xf32> to vector<4x256xf32>
    %55 = arith.mulf %50, %54 : vector<4x256xf32>
    %cst_18 = arith.constant 0.000000e+00 : f32
    %56 = vector.broadcast %cst_18 : f32 to vector<4x256xf32>
    %57 = arith.maximumf %55, %56 : vector<4x256xf32>
    %c0_19 = arith.constant 0 : index
    %c0_20 = arith.constant 0 : index
    %58 = vector.load %arg3[%c0_19, %c0_20] : memref<4x512xf32, #tpu.memory_space<vmem>>, vector<4x256xf32>
    tpu.vector_store %arg3[%c0_19, %c0_20], %57 {strides = array<i32>} : memref<4x512xf32, #tpu.memory_space<vmem>>, vector<4x256xf32>,
    %59 = vector.extract_strided_slice %36 {offsets = [0, 256], sizes = [4, 256], strides = [1, 1]} : vector<4x512xf32> to vector<4x256xf32>
    %cst_21 = arith.constant dense<0.000000e+00> : vector<4xf32>
    %60 = vector.multi_reduction <add>, %59, %cst_21 [1] : vector<4x256xf32> to vector<4xf32>
    %61 = vector.shape_cast %60 : vector<4xf32> to vector<4x1xf32>
    %cst_22 = arith.constant 3.906250e-03 : f32
    %62 = vector.broadcast %cst_22 : f32 to vector<4x1xf32>
    %63 = arith.mulf %61, %62 : vector<4x1xf32>
    %64 = arith.mulf %59, %59 : vector<4x256xf32>
    %cst_23 = arith.constant dense<0.000000e+00> : vector<4xf32>
    %65 = vector.multi_reduction <add>, %64, %cst_23 [1] : vector<4x256xf32> to vector<4xf32>
    %66 = vector.shape_cast %65 : vector<4xf32> to vector<4x1xf32>
    %cst_24 = arith.constant 3.906250e-03 : f32
    %67 = vector.broadcast %cst_24 : f32 to vector<4x1xf32>
    %68 = arith.mulf %66, %67 : vector<4x1xf32>
    %69 = arith.mulf %63, %63 : vector<4x1xf32>
    %70 = arith.subf %68, %69 : vector<4x1xf32>
    %71 = vector.broadcast %63 : vector<4x1xf32> to vector<4x256xf32>
    %72 = arith.subf %59, %71 : vector<4x256xf32>
    %cst_25 = arith.constant 9.99999974E-6 : f32
    %73 = vector.broadcast %cst_25 : f32 to vector<4x1xf32>
    %74 = arith.addf %70, %73 : vector<4x1xf32>
    %75 = math.rsqrt %74 : vector<4x1xf32>
    %76 = vector.broadcast %75 : vector<4x1xf32> to vector<4x256xf32>
    %77 = arith.mulf %72, %76 : vector<4x256xf32>
    %cst_26 = arith.constant 0.000000e+00 : f32
    %78 = vector.broadcast %cst_26 : f32 to vector<4x256xf32>
    %79 = arith.maximumf %77, %78 : vector<4x256xf32>
    %c0_27 = arith.constant 0 : index
    %c256 = arith.constant 256 : index
    %80 = vector.load %arg3[%c0_27, %c256] : memref<4x512xf32, #tpu.memory_space<vmem>>, vector<4x256xf32>
    tpu.vector_store %arg3[%c0_27, %c256], %79 {strides = array<i32>} : memref<4x512xf32, #tpu.memory_space<vmem>>, vector<4x256xf32>,
    return
  }
}

</mosaic_0001>

<bundles_post_ra>
// kernel: tpu_custom_call.1
= control target key start
LH: loop header
LB: loop body
LE: loop exit
PB: predicated region body
PF: predicated region fallthrough
CT: control target
= control target key end

     0   :  { %8 = vsyncpa [#allocation3], 0  ;;  %s1004_s0 = inlined_call_operand.hbm [shape: f32[4,512], index: 0, kind: input, shape index: {}]   ;;  %s1005_s1 = inlined_call_operand.hbm [shape: f32[4,36], index: 1, kind: input, shape index: {}]   ;;  %s1006_s2 = inlined_call_operand.hbm [shape: s32[4,512], index: 2, kind: input, shape index: {}]   ;;  %s1007_s3 = inlined_call_operand.hbm [shape: f32[4,512], index: 3, kind: output, shape index: {}]  }
   0x1   :  { %9 = vsyncpa [#allocation6], 0 }
   0x2   :  { %10 = vsyncpa [#allocation4], 0  ;;  %s689_s12 = smov [#allocation5]   ;;  %s690_s14 = smov [#allocation2]  }
   0x3   :  { %s27_s13 = sshll.u32 %s689_s12, 4  ;;  %s17_s15 = sshll.u32 %s690_s14, 4  ;;  %s28_s13 = int_to_ptr.vmem [resolvable:$true] %s27_s13  ;;  %s18_s15 = int_to_ptr.vmem [resolvable:$true] %s17_s15 }
   0x4   :  { %s595_s18 = scalar_lea.hbm %s1005_s1, 64 }
   0x5   :  { %p596_p0 = scmp.ne.s32.totalorder %s1005_s1, %s595_s18  ;;  %p599_p1 = scmp.lt.u32.totalorder %s595_s18, %s1005_s1 }
   0x7   :  { %p601_p2 = pnand %p599_p1, %p596_p0 }
   0x9   :  { %604 = shalt.err (!%p601_p2)
}
   0xa   :  { %s605_s23 = scalar_lea.vmem %s28_s13, 64  ;;  %p610_p4 = scmp.lt.s32.totalorder %s28_s13, %s28_s13 }
   0xb   :  { %p606_p3 = scmp.ne.s32.totalorder %s28_s13, %s605_s23  ;;  %p611_p5 = scmp.lt.s32.totalorder %s605_s23, %s605_s23 }
   0xd   :  { %p612_p6 = por %p611_p5, %p610_p4 }
   0xf   :  { %p613_p7 = pnand %p612_p6, %p606_p3 }
  0x11   :  { %616 = shalt.err (!%p613_p7)
}
  0x12   :  { %30 = dma.hbm_to_vmem [thread:$0]  %s1005_s1, 64, %s28_s13, [#allocation6]  }
  0x13   :  { %s617_s28 = scalar_lea.hbm %s1004_s0, 256 }
  0x14   :  { %p618_p8 = scmp.ne.s32.totalorder %s1004_s0, %s617_s28  ;;  %p621_p9 = scmp.lt.u32.totalorder %s617_s28, %s1004_s0 }
  0x16   :  { %p623_p10 = pnand %p621_p9, %p618_p8 }
  0x18   :  { %626 = shalt.err (!%p623_p10)
}
  0x19   :  { %s627_s6 = scalar_lea.vmem %s18_s15, 256  ;;  %p632_p12 = scmp.lt.s32.totalorder %s18_s15, %s18_s15 }
  0x1a   :  { %p628_p11 = scmp.ne.s32.totalorder %s18_s15, %s627_s6  ;;  %p633_p13 = scmp.lt.s32.totalorder %s627_s6, %s627_s6 }
  0x1c   :  { %p634_p0 = por %p633_p13, %p632_p12 }
  0x1e   :  { %p635_p1 = pnand %p634_p0, %p628_p11 }
  0x20   :  { %638 = shalt.err (!%p635_p1)
}
  0x21   :  { %20 = dma.hbm_to_vmem [thread:$0]  %s1004_s0, 256, %s18_s15, [#allocation3]  }
  0x22   :  { %s691_s8 = smov [#allocation7]   ;;  %s639_s12 = scalar_lea.hbm %s1006_s2, 256 }
  0x23   :  { %s37_s9 = sshll.u32 %s691_s8, 4  ;;  %p640_p2 = scmp.ne.s32.totalorder %s1006_s2, %s639_s12  ;;  %s38_s9 = int_to_ptr.vmem [resolvable:$true] %s37_s9 }
  0x24   :  { %p643_p3 = scmp.lt.u32.totalorder %s639_s12, %s1006_s2 }
  0x26   :  { %p645_p4 = pnand %p643_p3, %p640_p2 }
  0x28   :  { %648 = shalt.err (!%p645_p4)
}
  0x29   :  { %s649_s18 = scalar_lea.vmem %s38_s9, 256  ;;  %p654_p6 = scmp.lt.s32.totalorder %s38_s9, %s38_s9 }
  0x2a   :  { %p650_p5 = scmp.ne.s32.totalorder %s38_s9, %s649_s18  ;;  %p655_p7 = scmp.lt.s32.totalorder %s649_s18, %s649_s18 }
  0x2c   :  { %p656_p8 = por %p655_p7, %p654_p6 }
  0x2e   :  { %p657_p9 = pnand %p656_p8, %p650_p5 }
  0x30   :  { %660 = shalt.err (!%p657_p9)
}
  0x31   :  { %40 = dma.hbm_to_vmem [thread:$0]  %s1006_s2, 256, %s38_s9, [#allocation6]  }
  0x32   :  { %683 = dma.done.wait [#allocation3], 256  }
  0x33   :  { %684 = vsyncadd [#allocation3], 4294967040 }
  0x34   :  { %685 = dma.done.wait [#allocation6], 320  }
  0x35   :  { %686 = vsyncadd [#allocation6], 4294966976  ;;  %v754_v0 = vld [vmem:[#allocation2 + $0x8] sm:$0xff]  ;;  %v756_v1 = vld [vmem:[#allocation2] sm:$0xff]  ;;  %s692_s19 = smov 112   ;;  %s693_s2 = smov 16   ;;  %v84_v6 = vlaneseq }
  0x36   :  { %80 = vrot.lane.b32.xlu1 %v754_v0, %s692_s19  ;;  %76 = vrot.lane.b32.xlu0 %v756_v1, %s692_s19  ;;  %v762_v2 = vcombine.high %v754_v0, %v754_v0  ;;  %v768_v3 = vcombine.high %v756_v1, %v756_v1  ;;  %s694_s20 = smov 127   ;;  %s695_s21 = smov 1   ;;  %v792_v10 = vld [vmem:[#allocation7] sm:$0xff]  ;;  %v795_v14 = vld [vmem:[#allocation7 + $0x8] sm:$0xff]  ;;  %v696_v40 = vmov 0.0   ;;  %vm312_vm10 = vcmask 1043456  }
  0x37   :  { %v790_v9 = vand.u32 127, %v84_v6  ;;  %v54_v13 = vand.u32 1, %v792_v10  ;;  %v55_v17 = vand.u32 1, %v795_v14  ;;  %v58_v34 = vand.u32 2, %v792_v10  ;;  %406 = vmatprep.mubr.f32.mxu0 %v696_v40  ;;  %477 = vmatprep.mubr.f32.mxu1 %v696_v40  ;;  %s697_s22 = smov [#allocation8]  }
  0x38   :  { %v59_v35 = vand.u32 2, %v795_v14  ;;  %v62_v53 = vand.u32 4, %v792_v10  ;;  %v66_v59 = vand.u32 8, %v792_v10  ;;  %v63_v62 = vand.u32 4, %v795_v14  ;;  %s548_s23 = sshll.u32 %s697_s22, 4  ;;  %s549_s23 = int_to_ptr.vmem [resolvable:$true] %s548_s23 }
  0x39   :  { %vm86_vm0 = vcmp.lt.s32.totalorder %v790_v9, 112  ;;  %vm99_vm1 = vcmp.lt.s32.totalorder %v790_v9, 16  ;;  %vm56_vm2 = vcmp.ne.s32.totalorder %v54_v13, 0  ;;  %vm57_vm3 = vcmp.ne.s32.totalorder %v55_v17, 0  ;;  %s661_s24 = scalar_lea.vmem %s549_s23, 256  ;;  %p666_p11 = scmp.lt.s32.totalorder %s549_s23, %s549_s23 }
  0x3a   :  { %82 = vrot.lane.b32.xlu1 %v762_v2, %s692_s19  ;;  %91 = vrot.lane.b32.xlu0 %v756_v1, %s693_s2  ;;  %vm60_vm4 = vcmp.ne.s32.totalorder %v58_v34, 0  ;;  %vm61_vm5 = vcmp.ne.s32.totalorder %v59_v35, 0  ;;  %vm138_vm6 = vcmp.lt.s32.totalorder %v790_v9, 127  ;;  %vm151_vm7 = vcmp.lt.s32.totalorder %v790_v9, 1  ;;  %p662_p10 = scmp.ne.s32.totalorder %s549_s23, %s661_s24  ;;  %p667_p12 = scmp.lt.s32.totalorder %s661_s24, %s661_s24 }
  0x3b   :  { %vm867_vm8 = vcmp.ne.s32.totalorder %v62_v53, 0  ;;  %vm873_vm9 = vcmp.ne.s32.totalorder %v66_v59, 0  ;;  %v67_v13 = vand.u32 8, %v795_v14  ;;  %vm890_vm11 = vcmp.ne.s32.totalorder %v63_v62, 0 }
  0x3c   :  { %vm330_vm13 = vcmask 293888   ;;  %p668_p13 = por %p667_p12, %p666_p11 }
  0x3d   :  { %vm902_vm12 = vcmp.ne.s32.totalorder %v67_v13, 0 }
  0x3e   :  { %93 = vrot.lane.b32.xlu1 %v768_v3, %s693_s2  ;;  %78 = vrot.lane.b32.xlu0 %v768_v3, %s692_s19  ;;  %p669_p0 = pnand %p668_p13, %p662_p10 }
  0x42   :  { %97 = vrot.lane.b32.xlu1 %v762_v2, %s693_s2  ;;  %95 = vrot.lane.b32.xlu0 %v754_v0, %s693_s2 }
  0x46   :  { %178 = vrot.lane.b32.xlu1 %v768_v3, %s694_s20  ;;  %176 = vrot.lane.b32.xlu0 %v756_v1, %s694_s20 }
  0x4a   :  { %182 = vrot.lane.b32.xlu1 %v762_v2, %s694_s20  ;;  %180 = vrot.lane.b32.xlu0 %v754_v0, %s694_s20 }
  0x4e   :  { %190 = vrot.lane.b32.xlu1 %v768_v3, %s695_s21  ;;  %188 = vrot.lane.b32.xlu0 %v756_v1, %s695_s21 }
  0x52   :  { %194 = vrot.lane.b32.xlu1 %v762_v2, %s695_s21  ;;  %192 = vrot.lane.b32.xlu0 %v754_v0, %s695_s21 }
  0xa8   :  { %v81_v4 = vpop.permute.xlu1 %80  ;;  %v77_v5 = vpop.permute.xlu0 %76 }
  0xac   :  { %v83_v7 = vpop.permute.xlu1 %82  ;;  %v92_v8 = vpop.permute.xlu0 %91 }
  0xad   :  { %v87_v18 = vsel %vm86_vm0, %v81_v4, %v83_v7  ;;  %v90_v19 = vsel %vm86_vm0, %v83_v7, %v77_v5 }
  0xae   :  { %v109_v29 = vcombine.low %v87_v18, %v90_v19 }
  0xb0   :  { %v94_v11 = vpop.permute.xlu1 %93  ;;  %v79_v12 = vpop.permute.xlu0 %78 }
  0xb1   :  { %v88_v15 = vsel %vm86_vm0, %v79_v12, %v81_v4  ;;  %v89_v16 = vsel %vm86_vm0, %v77_v5, %v79_v12  ;;  %v102_v22 = vsel %vm99_vm1, %v92_v8, %v94_v11 }
  0xb2   :  { %v108_v26 = vcombine.low %v89_v16, %v88_v15 }
  0xb4   :  { %v98_v20 = vpop.permute.xlu1 %97  ;;  %v96_v21 = vpop.permute.xlu0 %95 }
  0xb5   :  { %v103_v23 = vsel %vm99_vm1, %v98_v20, %v92_v8  ;;  %v100_v24 = vsel %vm99_vm1, %v96_v21, %v98_v20  ;;  %v101_v25 = vsel %vm99_vm1, %v94_v11, %v96_v21 }
  0xb6   :  { %v116_v27 = vcombine.low %v103_v23, %v102_v22  ;;  %v117_v28 = vcombine.low %v101_v25, %v100_v24 }
  0xb8   :  { %v800_v30 = vsel %vm56_vm2, %v108_v26, %v116_v27  ;;  %v806_v32 = vsel %vm57_vm3, %v109_v29, %v117_v28  ;;  %v821_v36 = vsel %vm60_vm4, %v116_v27, %v108_v26  ;;  %v828_v38 = vsel %vm61_vm5, %v117_v28, %v109_v29  ;;  %v177_v41 = vpop.permute.xlu0 %176  ;;  %v179_v42 = vpop.permute.xlu1 %178 }
  0xb9   :  { %130 = vrot.lane.b32.xlu0 %v800_v30, %s694_s20  ;;  %v126_v31 = vcombine.high %v800_v30, %v800_v30  ;;  %v127_v33 = vcombine.high %v806_v32, %v806_v32  ;;  %v222_v37 = vcombine.high %v821_v36, %v821_v36  ;;  %v223_v39 = vcombine.high %v828_v38, %v828_v38 }
  0xba   :  { %v186_v54 = vsel %vm138_vm6, %v177_v41, %v179_v42 }
  0xbb   :  { %132 = vrot.lane.b32.xlu1 %v126_v31, %s694_s20 }
  0xbc   :  { %v181_v43 = vpop.permute.xlu0 %180  ;;  %v183_v44 = vpop.permute.xlu1 %182 }
  0xbd   :  { %134 = vrot.lane.b32.xlu0 %v806_v32, %s694_s20  ;;  %v185_v55 = vsel %vm138_vm6, %v179_v42, %v181_v43  ;;  %v187_v60 = vsel %vm138_vm6, %v183_v44, %v177_v41  ;;  %v184_v61 = vsel %vm138_vm6, %v181_v43, %v183_v44 }
  0xbe   :  { %v859_v63 = vcombine.low %v186_v54, %v185_v55  ;;  %v871_v10 = vcombine.low %v184_v61, %v187_v60 }
  0xbf   :  { %136 = vrot.lane.b32.xlu1 %v127_v33, %s694_s20 }
  0xc0   :  { %v189_v45 = vpop.permute.xlu0 %188  ;;  %v191_v46 = vpop.permute.xlu1 %190 }
  0xc1   :  { %143 = vrot.lane.b32.xlu0 %v800_v30, %s695_s21  ;;  %v198_v56 = vsel %vm151_vm7, %v189_v45, %v191_v46 }
  0xc3   :  { %145 = vrot.lane.b32.xlu1 %v126_v31, %s695_s21 }
  0xc4   :  { %v193_v47 = vpop.permute.xlu0 %192  ;;  %v195_v48 = vpop.permute.xlu1 %194 }
  0xc5   :  { %147 = vrot.lane.b32.xlu0 %v806_v32, %s695_s21  ;;  %v199_v57 = vsel %vm151_vm7, %v195_v48, %v189_v45  ;;  %v196_v5 = vsel %vm151_vm7, %v193_v47, %v195_v48  ;;  %v197_v6 = vsel %vm151_vm7, %v191_v46, %v193_v47  ;;  %v277_v47 = vcombine.low %v806_v32, %v806_v32 }
  0xc6   :  { %v861_v4 = vcombine.low %v199_v57, %v198_v56  ;;  %v213_v15 = vcombine.low %v197_v6, %v196_v5 }
  0xc7   :  { %149 = vrot.lane.b32.xlu1 %v127_v33, %s695_s21 }
  0xc8   :  { %v216_v21 = vsel %vm867_vm8, %v859_v63, %v861_v4  ;;  %v217_v35 = vsel %vm890_vm11, %v871_v10, %v213_v15 }
  0xc9   :  { %226 = vrot.lane.b32.xlu0 %v821_v36, %s694_s20  ;;  %v288_v33 = vcombine.low %v216_v21, %v216_v21 }
  0xcb   :  { %228 = vrot.lane.b32.xlu1 %v222_v37, %s694_s20 }
  0xcd   :  { %230 = vrot.lane.b32.xlu0 %v828_v38, %s694_s20 }
  0xcf   :  { %232 = vrot.lane.b32.xlu1 %v223_v39, %s694_s20 }
  0xd1   :  { %238 = vrot.lane.b32.xlu0 %v821_v36, %s695_s21 }
  0xd3   :  { %240 = vrot.lane.b32.xlu1 %v222_v37, %s695_s21  ;;  %v276_v37 = vcombine.low %v800_v30, %v800_v30 }
  0xd5   :  { %242 = vrot.lane.b32.xlu0 %v828_v38, %s695_s21 }
  0xd7   :  { %244 = vrot.lane.b32.xlu1 %v223_v39, %s695_s21 }
 0x12b   :  { %v131_v49 = vpop.permute.xlu0 %130 }
 0x12d   :  { %v133_v50 = vpop.permute.xlu1 %132 }
 0x12e   :  { %v141_v19 = vsel %vm138_vm6, %v131_v49, %v133_v50 }
 0x12f   :  { %v135_v51 = vpop.permute.xlu0 %134 }
 0x130   :  { %v140_v16 = vsel %vm138_vm6, %v133_v50, %v135_v51  ;;  %v289_v50 = vcombine.low %v217_v35, %v217_v35 }
 0x131   :  { %v137_v52 = vpop.permute.xlu1 %136  ;;  %v160_v26 = vcombine.low %v141_v19, %v140_v16  ;;  %v219_v19 = vsel %vm902_vm12, %v213_v15, %v871_v10  ;;  %v305_v10 = vcombine.low %v828_v38, %v828_v38 }
 0x132   :  { %v139_v17 = vsel %vm138_vm6, %v135_v51, %v137_v52  ;;  %v142_v18 = vsel %vm138_vm6, %v137_v52, %v131_v49 }
 0x133   :  { %v144_v58 = vpop.permute.xlu0 %143  ;;  %v161_v27 = vcombine.low %v139_v17, %v142_v18  ;;  %v218_v18 = vsel %vm873_vm9, %v861_v4, %v859_v63  ;;  %v304_v4 = vcombine.low %v821_v36, %v821_v36 }
 0x135   :  { %v146_v7 = vpop.permute.xlu1 %145 }
 0x136   :  { %v154_v22 = vsel %vm151_vm7, %v144_v58, %v146_v7 }
 0x137   :  { %v148_v11 = vpop.permute.xlu0 %147 }
 0x138   :  { %v153_v23 = vsel %vm151_vm7, %v146_v7, %v148_v11 }
 0x139   :  { %v150_v20 = vpop.permute.xlu1 %149 }
 0x13a   :  { %v152_v24 = vsel %vm151_vm7, %v148_v11, %v150_v20  ;;  %v155_v25 = vsel %vm151_vm7, %v150_v20, %v144_v58 }
 0x13b   :  { %v168_v28 = vcombine.low %v155_v25, %v154_v22  ;;  %v169_v29 = vcombine.low %v153_v23, %v152_v24  ;;  %v227_v31 = vpop.permute.xlu0 %226 }
 0x13d   :  { %v229_v39 = vpop.permute.xlu1 %228  ;;  %v172_v40 = vsel %vm867_vm8, %v160_v26, %v168_v28  ;;  %v174_v41 = vsel %vm873_vm9, %v168_v28, %v160_v26  ;;  %v173_v42 = vsel %vm890_vm11, %v161_v27, %v169_v29  ;;  %v175_v43 = vsel %vm902_vm12, %v169_v29, %v161_v27 }
 0x13e   :  { %v272_v44 = vcombine.high %v172_v40, %v172_v40  ;;  %v282_v45 = vcombine.high %v174_v41, %v174_v41  ;;  %v273_v46 = vcombine.high %v173_v42, %v173_v42  ;;  %v283_v49 = vcombine.high %v175_v43, %v175_v43 }
 0x13f   :  { %v231_v48 = vpop.permute.xlu0 %230  ;;  %v313_v51 = vsel %vm312_vm10, %v172_v40, %v276_v37  ;;  %v317_v52 = vsel %vm312_vm10, %v174_v41, %v288_v33  ;;  %v315_v56 = vsel %vm312_vm10, %v173_v42, %v277_v47  ;;  %v319_v62 = vsel %vm312_vm10, %v175_v43, %v289_v50 }
 0x140   :  { %v314_v53 = vsel %vm312_vm10, %v272_v44, %v800_v30  ;;  %v318_v54 = vsel %vm312_vm10, %v282_v45, %v216_v21  ;;  %v316_v55 = vsel %vm312_vm10, %v273_v46, %v806_v32  ;;  %v320_v59 = vsel %vm312_vm10, %v283_v49, %v217_v35 }
 0x141   :  { %v233_v57 = vpop.permute.xlu1 %232  ;;  %v564_v58 = vpack.c.bf16 %v318_v54, %v314_v53  ;;  %v572_v60 = vpack.c.bf16 %v320_v59, %v316_v55  ;;  %v566_v61 = vpack.c.bf16 %v317_v52, %v313_v51  ;;  %v574_v6 = vpack.c.bf16 %v319_v62, %v315_v56 }
 0x142   :  { %v235_v32 = vsel %vm138_vm6, %v229_v39, %v231_v48  ;;  %v234_v11 = vsel %vm138_vm6, %v231_v48, %v233_v57  ;;  %v237_v13 = vsel %vm138_vm6, %v233_v57, %v227_v31  ;;  %v236_v16 = vsel %vm138_vm6, %v227_v31, %v229_v39 }
 0x143   :  { %565 = vmatprep.subr.bf16.mxu0 %v564_v58  ;;  %v239_v5 = vpop.permute.xlu0 %238  ;;  %573 = vmatprep.subr.bf16.mxu1 %v572_v60  ;;  %v254_v24 = vcombine.low %v236_v16, %v235_v32  ;;  %v255_v25 = vcombine.low %v234_v11, %v237_v13  ;;  %v294_v28 = vcombine.low %v218_v18, %v218_v18 }
 0x144   :  { %567 = vmatpush1.bf16.msra.mxu0 %v566_v61  ;;  %575 = vmatpush1.bf16.msra.mxu1 %v574_v6  ;;  %v295_v29 = vcombine.low %v219_v19, %v219_v19  ;;  %v322_v33 = vsel %vm312_vm10, %v768_v3, %v218_v18  ;;  %v324_v35 = vsel %vm312_vm10, %v762_v2, %v219_v19 }
 0x145   :  { %v241_v30 = vpop.permute.xlu1 %240  ;;  %v321_v2 = vsel %vm312_vm10, %v756_v1, %v294_v28 }
 0x146   :  { %v248_v20 = vsel %vm151_vm7, %v239_v5, %v241_v30  ;;  %v323_v43 = vsel %vm312_vm10, %v754_v0, %v295_v29 }
 0x147   :  { %v243_v7 = vpop.permute.xlu0 %242 }
 0x148   :  { %v247_v21 = vsel %vm151_vm7, %v241_v30, %v243_v7 }
 0x149   :  { %v245_v17 = vpop.permute.xlu1 %244 }
 0x14a   :  { %v246_v22 = vsel %vm151_vm7, %v243_v7, %v245_v17  ;;  %v249_v23 = vsel %vm151_vm7, %v245_v17, %v239_v5 }
 0x14b   :  { %v262_v26 = vcombine.low %v249_v23, %v248_v20  ;;  %v263_v63 = vcombine.low %v247_v21, %v246_v22 }
 0x14d   :  { %v266_v15 = vsel %vm867_vm8, %v254_v24, %v262_v26  ;;  %v267_v27 = vsel %vm890_vm11, %v255_v25, %v263_v63  ;;  %v268_v8 = vsel %vm873_vm9, %v262_v26, %v254_v24  ;;  %v269_v14 = vsel %vm902_vm12, %v263_v63, %v255_v25 }
 0x14e   :  { %v300_v9 = vcombine.high %v266_v15, %v266_v15  ;;  %v301_v31 = vcombine.high %v267_v27, %v267_v27  ;;  %v325_v37 = vsel %vm312_vm10, %v266_v15, %v304_v4  ;;  %v327_v39 = vsel %vm312_vm10, %v267_v27, %v305_v10 }
 0x14f   :  { %v570_v44 = vpack.c.bf16 %v325_v37, %v321_v2  ;;  %v578_v12 = vpack.c.bf16 %v327_v39, %v323_v43  ;;  %v310_v34 = vcombine.high %v268_v8, %v268_v8  ;;  %v311_v45 = vcombine.high %v269_v14, %v269_v14 }
 0x150   :  { %v326_v40 = vsel %vm312_vm10, %v300_v9, %v821_v36  ;;  %v328_v41 = vsel %vm312_vm10, %v301_v31, %v828_v38  ;;  %v329_v36 = vld [vmem:[#allocation5] sm:$0xf] }
 0x151   :  { %v568_v3 = vpack.c.bf16 %v326_v40, %v322_v33  ;;  %v576_v42 = vpack.c.bf16 %v328_v41, %v324_v35 }
 0x153   :  { %569 = vmatprep.subr.bf16.mxu0 %v568_v3  ;;  %577 = vmatprep.subr.bf16.mxu1 %v576_v42 }
 0x154   :  { %571 = vmatpush1.bf16.msra.mxu0 %v570_v44  ;;  %579 = vmatpush1.bf16.msra.mxu1 %v578_v12 }
 0x155   :  { %558 = vmatprep.subr.msk.mxu0 %vm312_vm10, %v310_v34  ;;  %561 = vmatprep.subr.msk.mxu1 %vm312_vm10, %v311_v45 }
 0x158   :  { %559 = vmatpush1.msk.msra.mxu0 %vm312_vm10, %v268_v8  ;;  %562 = vmatpush1.msk.msra.mxu1 %vm312_vm10, %v269_v14 }
 0x159   :  { %560 = vmatmul.mubr.msk.f32.vlgmr.msra.gmra.mrb[0].mxu0 %vm330_vm13, %v329_v36  ;;  %563 = vmatmul.mubr.msk.f32.vlgmr.msra.gmra.mrb[0].mxu1 %vm330_vm13, %v329_v36 }
 0x22c   :  { %v408_v0 = vpop.f32.mrb[0].mxu0  ;;  %v479_v1 = vpop.f32.mrb[0].mxu1 }
 0x22d   :  { %v490_v38 = vmul.f32 %v408_v0, %v408_v0  ;;  %v519_v46 = vmul.f32 %v479_v1, %v479_v1  ;;  %v410_v47 = vpop.f32.mrb[1].mxu0  ;;  %v481_v48 = vpop.f32.mrb[1].mxu1  ;;  %v484_v49 = vsel %vm312_vm10, %v408_v0, 0.0  ;;  %v513_v50 = vsel %vm312_vm10, %v479_v1, 0.0 }
 0x22e   :  { %v485_v51 = vsel %vm312_vm10, %v410_v47, 0.0  ;;  %v491_v52 = vmul.f32 %v410_v47, %v410_v47  ;;  %v514_v53 = vsel %vm312_vm10, %v481_v48, 0.0  ;;  %v520_v54 = vmul.f32 %v481_v48, %v481_v48 }
 0x22f   :  { %v486_v55 = vadd.f32 %v485_v51, %v484_v49  ;;  %v515_v56 = vadd.f32 %v514_v53, %v513_v50  ;;  %v492_v57 = vsel %vm312_vm10, %v490_v38, 0.0  ;;  %v521_v58 = vsel %vm312_vm10, %v519_v46, 0.0 }
 0x230   :  { %v493_v59 = vsel %vm312_vm10, %v491_v52, 0.0  ;;  %v522_v60 = vsel %vm312_vm10, %v520_v54, 0.0 }
 0x231   :  { %487 = vadd.xlane.f32.xlu0 %v486_v55  ;;  %516 = vadd.xlane.f32.xlu1 %v515_v56  ;;  %v494_v61 = vadd.f32 %v493_v59, %v492_v57  ;;  %v523_v62 = vadd.f32 %v522_v60, %v521_v58 }
 0x235   :  { %495 = vadd.xlane.f32.xlu0 %v494_v61 }
 0x239   :  { %524 = vadd.xlane.f32.xlu0 %v523_v62 }
 0x2be   :  { %v488_v5 = vpop.xlane.xlu0 %487  ;;  %v517_v30 = vpop.xlane.xlu1 %516 }
 0x2bf   :  { %v489_v6 = vmul.f32 0.00390625, %v488_v5  ;;  %v518_v32 = vmul.f32 0.00390625, %v517_v30 }
 0x2c1   :  { %v498_v11 = vmul.f32 %v489_v6, %v489_v6  ;;  %v527_v17 = vmul.f32 %v518_v32, %v518_v32  ;;  %v500_v23 = vsub.f32 %v408_v0, %v489_v6  ;;  %v501_v24 = vsub.f32 %v410_v47, %v489_v6 }
 0x2c2   :  { %v496_v7 = vpop.xlane.xlu0 %495  ;;  %v529_v4 = vsub.f32 %v479_v1, %v518_v32  ;;  %v530_v10 = vsub.f32 %v481_v48, %v518_v32 }
 0x2c3   :  { %v497_v13 = vmul.f32 0.00390625, %v496_v7 }
 0x2c5   :  { %v499_v16 = vsub.f32 %v497_v13, %v498_v11 }
 0x2c6   :  { %v525_v18 = vpop.xlane.xlu0 %524 }
 0x2c7   :  { %v502_v19 = vadd.f32 1e-05, %v499_v16  ;;  %v526_v20 = vmul.f32 0.00390625, %v525_v18 }
 0x2c9   :  { %591 = vrsqrt.f32 %v502_v19  ;;  %v528_v21 = vsub.f32 %v526_v20, %v527_v17 }
 0x2cb   :  { %v531_v22 = vadd.f32 1e-05, %v528_v21 }
 0x2cd   :  { %593 = vrsqrt.f32 %v531_v22 }
 0x2d3   :  { %v592_v25 = vpop.eup %591 }
 0x2d4   :  { %v504_v26 = vmul.f32 %v592_v25, %v500_v23  ;;  %v505_v63 = vmul.f32 %v592_v25, %v501_v24 }
 0x2d6   :  { %v506_v15 = vmax.f32 %v504_v26, 0.0  ;;  %v507_v27 = vmax.f32 %v505_v63, 0.0 }
 0x2d7   :  { %v594_v28 = vpop.eup %593 }
 0x2d8   :  { %v510_v29 = vcombine.low %v506_v15, %v507_v27  ;;  %v533_v9 = vmul.f32 %v594_v28, %v529_v4  ;;  %v534_v31 = vmul.f32 %v594_v28, %v530_v10 }
 0x2da   :  { %512 = vst [vmem:[#allocation8] sm:$0xff] %v510_v29  ;;  %v535_v33 = vmax.f32 %v533_v9, 0.0  ;;  %v536_v35 = vmax.f32 %v534_v31, 0.0 }
 0x2dc   :  { %v539_v37 = vcombine.low %v535_v33, %v536_v35 }
 0x2de   :  { %541 = vst [vmem:[#allocation8 + $0x8] sm:$0xff] %v539_v37 }
 0x2df   :  { %672 = shalt.err (!%p669_p0)
}
 0x2e0   :  { %s673_s27 = scalar_lea.hbm %s1007_s3, 256 }
 0x2e1   :  { %p674_p1 = scmp.ne.s32.totalorder %s1007_s3, %s673_s27  ;;  %p677_p2 = scmp.lt.u32.totalorder %s673_s27, %s1007_s3 }
 0x2e3   :  { %p679_p3 = pnand %p677_p2, %p674_p1 }
 0x2e5   :  { %682 = shalt.err (!%p679_p3)
}
 0x2e6   :  { %551 = dma.vmem_to_hbm [thread:$0]  %s549_s23, 256, %s1007_s3, [#allocation4]  }
 0x2e7   :  { %687 = dma.done.wait [#allocation4], 256  }
 0x2e8   :  { %688 = vsyncadd [#allocation4], 4294967040 }
 0x2e9   :  { %555 = vsyncpa [#allocation3], 1 }
 0x2ea   :  { %556 = vsyncpa [#allocation6], 1 }
 0x2eb   :  { %557 = vsyncpa [#allocation4], 1 }

</bundles_post_ra>
